<compile_context>
chip_gen: v6e
topology: v6e:2x2x1
jax: 0.10.0
libtpu: 0.0.40
codegen_flags: <defaults>
</compile_context>

<pallas_src>
import functools
import math

import jax
import jax.numpy as jnp
from jax.experimental import pallas as pl
from jax.experimental.pallas import tpu as pltpu

# ---- hyperparameters consistent with RNN(model_type, ntokens, emsize, nhid, nlayers, dropout) ----
MODEL_TYPE = "RNN_TANH"      # supported here: 'RNN_TANH' or 'RNN_RELU'
NTOKENS    = 50
EMSIZE     = 32
NHID       = 32
NLAYERS    = 2
SEQ        = 8
BATCH      = 2
NPAD       = 128             # lane-dense decoder width (ntokens 50 -> 128, zero-padded)
NPAD_TOK   = 128             # one-hot / embedding-table row padding (50 -> 128)


# ----------------------------- Pallas kernel -----------------------------

def fused_rnn_kernel(*refs, nlayers, seq_len, batch, relu):
    """Embedding + whole RNN stack (wavefronted) + decoder in one kernel body."""
    tok_ref, h0_ref, emb_ref = refs[0], refs[1], refs[2]
    layer_refs = refs[3:3 + 3 * nlayers]                     # (wih, whh, b) per layer
    decw_ref  = refs[3 + 3 * nlayers]
    decb_ref  = refs[4 + 3 * nlayers]
    logits_ref = refs[5 + 3 * nlayers]
    hn_ref     = refs[6 + 3 * nlayers]

    act = (lambda v: jnp.maximum(v, 0.0)) if relu else jnp.tanh
    sb = seq_len * batch

    # ---- fused embedding gather: one-hot tokens @ padded table, on the MXU ----
    tok = tok_ref[...]                                            # [S*B, 1] int32
    lane = jax.lax.broadcasted_iota(jnp.int32, (sb, emb_ref.shape[0]), 1)
    onehot = jnp.where(lane == tok, 1.0, 0.0).astype(jnp.bfloat16)   # [S*B, 128]
    emb = jnp.dot(onehot, emb_ref[...],
                  preferred_element_type=jnp.float32)             # [S*B, E] (exact)

    # per-layer weights loaded once into vregs
    wih  = [layer_refs[3 * l][...] for l in range(nlayers)]       # bf16
    whh  = [layer_refs[3 * l + 1][...] for l in range(nlayers)]   # bf16
    bias = [layer_refs[3 * l + 2][...] for l in range(nlayers)]   # f32 (bih+bhh pre-summed)

    # layer-0 input projection for ALL timesteps in one MXU pass (off the serial chain)
    proj0 = jnp.dot(emb.astype(jnp.bfloat16), wih[0],
                    preferred_element_type=jnp.float32) + bias[0]  # [S*B, H] f32

    # hidden states kept as live values (vregs): bf16 MXU operand + f32 copy for hn
    h_bf  = [h0_ref[l].astype(jnp.bfloat16) for l in range(nlayers)]
    h_f32 = [h0_ref[l] for l in range(nlayers)]
    outs_last = [None] * seq_len
    prev_out = [None] * nlayers                                   # layer outputs from step k-1

    # ---- wavefront over (layer, time): step k runs layer l at timestep t = k-l ----
    # chain length drops from nlayers*seq to nlayers+seq-1 dependent MXU->tanh links.
    for k in range(seq_len + nlayers - 1):
        new_out = [None] * nlayers
        for l in range(nlayers):
            t = k - l
            if t < 0 or t >= seq_len:
                continue
            if l == 0:
                pre = proj0[t * batch:(t + 1) * batch, :] + jnp.dot(
                    h_bf[0], whh[0], preferred_element_type=jnp.float32)
            else:
                # input term (prev layer, same timestep, produced at step k-1) +
                # recurrent term: two independent MXU dots, zero VMEM traffic.
                pre = (jnp.dot(prev_out[l - 1], wih[l], preferred_element_type=jnp.float32)
                       + jnp.dot(h_bf[l], whh[l], preferred_element_type=jnp.float32)
                       + bias[l])
            hf = act(pre)                                         # f32 (v5e-safe)
            hb = hf.astype(jnp.bfloat16)
            h_f32[l] = hf
            h_bf[l] = hb
            new_out[l] = hb
            if l == nlayers - 1:
                outs_last[t] = hb
        prev_out = new_out

    # ---- decoder: whole sequence in one lane-dense [S*B, 128] MXU pass ----
    cur = jnp.concatenate(outs_last, axis=0)                      # [S*B, H] bf16, in vregs
    logits_ref[...] = (jnp.dot(cur, decw_ref[...], preferred_element_type=jnp.float32)
                       + decb_ref[...])
    for l in range(nlayers):
        hn_ref[l] = h_f32[l]


# --------------------------- pallas_call wrapper ---------------------------

def _full_spec(shape):
    zeros = (0,) * len(shape)
    return pl.BlockSpec(shape, lambda i, z=zeros: z)


def rnn_forward_pallas(x_tokens, h0, params):
    """x_tokens: [seq_len, batch] int32; h0: [nlayers, batch, nhid] f32.
    Returns (decoded [seq_len, batch, ntokens], h_n [nlayers, batch, nhid])."""
    S, B = x_tokens.shape
    E, H = EMSIZE, NHID
    tok = x_tokens.reshape(S * B, 1).astype(jnp.int32)            # row = t*B + b

    layer_args, layer_specs = [], []
    for lp in params["layers"]:
        layer_args += [lp["wih"], lp["whh"], lp["b"]]
        layer_specs += [_full_spec(lp["wih"].shape), _full_spec(lp["whh"].shape),
                        _full_spec(lp["b"].shape)]

    kernel = functools.partial(fused_rnn_kernel, nlayers=NLAYERS, seq_len=S,
                               batch=B, relu=(MODEL_TYPE == "RNN_RELU"))

    logits_pad, h_n = pl.pallas_call(
        kernel,
        out_shape=(jax.ShapeDtypeStruct((S * B, NPAD), jnp.float32),
                   jax.ShapeDtypeStruct((NLAYERS, B, H), jnp.float32)),
        grid=(1,),
        in_specs=[_full_spec((S * B, 1)),                        # token ids
                  _full_spec((NLAYERS, B, H)),                   # h0
                  _full_spec((NPAD_TOK, E))]                     # padded embedding table
                 + layer_specs
                 + [_full_spec((H, NPAD)),                       # decoder weight (padded)
                    _full_spec((1, NPAD))],                      # decoder bias   (padded)
        out_specs=(_full_spec((S * B, NPAD)),
                   _full_spec((NLAYERS, B, H))),
        compiler_params=pltpu.CompilerParams(dimension_semantics=("arbitrary",)),
    )(tok, h0, params["emb_pad"], *layer_args, params["dec_w_pad"], params["dec_b_pad"])

    decoded = logits_pad[:, :NTOKENS].reshape(S, B, NTOKENS)
    return decoded, h_n


# ------------------------------ parameters ------------------------------

def init_params(key):
    keys = jax.random.split(key, 2 + NLAYERS)
    initrange = 0.1
    # nn.Embedding: uniform(-0.1, 0.1); zero-padded rows 50..127, bf16 for the MXU
    emb = jax.random.uniform(keys[0], (NTOKENS, EMSIZE), jnp.float32, -initrange, initrange)
    emb_pad = jnp.zeros((NPAD_TOK, EMSIZE), jnp.float32).at[:NTOKENS].set(emb)
    emb_pad = emb_pad.astype(jnp.bfloat16)
    # nn.Linear decoder: weight uniform(-0.1, 0.1), bias zero; zero-padded to 128 lanes
    dec_w = jax.random.uniform(keys[1], (NHID, NTOKENS), jnp.float32, -initrange, initrange)
    dec_w_pad = jnp.zeros((NHID, NPAD), jnp.float32).at[:, :NTOKENS].set(dec_w)
    dec_w_pad = dec_w_pad.astype(jnp.bfloat16)
    dec_b_pad = jnp.zeros((1, NPAD), jnp.float32)
    # nn.RNN default init: uniform(-1/sqrt(nhid), 1/sqrt(nhid)); weights stored transposed.
    # bih + bhh pre-summed into one bias per layer.
    stdv = 1.0 / math.sqrt(NHID)
    layers = []
    for l in range(NLAYERS):
        lk = jax.random.split(keys[2 + l], 4)
        in_dim = EMSIZE if l == 0 else NHID
        layers.append(dict(
            wih=jax.random.uniform(lk[0], (in_dim, NHID), jnp.float32, -stdv, stdv).astype(jnp.bfloat16),
            whh=jax.random.uniform(lk[1], (NHID, NHID), jnp.float32, -stdv, stdv).astype(jnp.bfloat16),
            b=(jax.random.uniform(lk[2], (1, NHID), jnp.float32, -stdv, stdv)
               + jax.random.uniform(lk[3], (1, NHID), jnp.float32, -stdv, stdv)),
        ))
    return dict(emb_pad=emb_pad, dec_w_pad=dec_w_pad, dec_b_pad=dec_b_pad, layers=layers)


# ------------------- pure-JAX reference (for checking) -------------------

def ref_forward(x_tokens, h0, params):
    act = (lambda v: jnp.maximum(v, 0.0)) if MODEL_TYPE == "RNN_RELU" else jnp.tanh
    emb_tab = params["emb_pad"].astype(jnp.float32)[:NTOKENS]
    cur = emb_tab[x_tokens]                                       # [S, B, E]
    h_final = []
    for l in range(NLAYERS):
        lp = params["layers"][l]
        wih = lp["wih"].astype(jnp.float32)
        whh = lp["whh"].astype(jnp.float32)
        b = lp["b"][0]
        h = h0[l]
        outs = []
        for t in range(cur.shape[0]):
            h = act(cur[t] @ wih + h @ whh + b)
            outs.append(h)
        cur = jnp.stack(outs, axis=0)                             # [S, B, H]
        h_final.append(h)
    h_n = jnp.stack(h_final, axis=0)                              # [NLAYERS, B, H]
    dec_w = params["dec_w_pad"].astype(jnp.float32)[:, :NTOKENS]
    dec_b = params["dec_b_pad"][0, :NTOKENS]
    decoded = cur @ dec_w + dec_b
    return decoded, h_n


# ------------------------------------ main ------------------------------------

if __name__ == "__main__":
    key = jax.random.PRNGKey(0)
    kp, kx, kh = jax.random.split(key, 3)
    params = init_params(kp)

    x = jax.random.randint(kx, (SEQ, BATCH), 0, NTOKENS)                       # [seq_len, batch]
    # hidden state input (init_hidden() would give zeros; use a small random h to exercise the path)
    h0 = 0.1 * jax.random.normal(kh, (NLAYERS, BATCH, NHID), jnp.float32)

    decoded, h_n = rnn_forward_pallas(x, h0, params)
    decoded = jax.block_until_ready(decoded)
    h_n = jax.block_until_ready(h_n)

    ref_dec, ref_hn = ref_forward(x, h0, params)
    assert decoded.shape == (SEQ, BATCH, NTOKENS), decoded.shape
    assert h_n.shape == (NLAYERS, BATCH, NHID), h_n.shape
    assert bool(jnp.all(jnp.isfinite(decoded))) and bool(jnp.all(jnp.isfinite(h_n)))
    assert bool(jnp.allclose(h_n, ref_hn, atol=2e-2, rtol=2e-2)), \
        float(jnp.max(jnp.abs(h_n - ref_hn)))
    assert bool(jnp.allclose(decoded, ref_dec, atol=2e-2, rtol=2e-2)), \
        float(jnp.max(jnp.abs(decoded - ref_dec)))

    print("KERNEL_OK")
</pallas_src>

<mosaic_0001>
module attributes {stable_mosaic.version = 11 : i64} {
  func.func @fused_rnn_kernel(%arg0: i32, %arg1: memref<16x1xi32, #tpu.memory_space<vmem>>, %arg2: memref<2x2x32xf32, #tpu.memory_space<vmem>>, %arg3: memref<128x32xbf16, #tpu.memory_space<vmem>>, %arg4: memref<32x32xbf16, #tpu.memory_space<vmem>>, %arg5: memref<32x32xbf16, #tpu.memory_space<vmem>>, %arg6: memref<1x32xf32, #tpu.memory_space<vmem>>, %arg7: memref<32x32xbf16, #tpu.memory_space<vmem>>, %arg8: memref<32x32xbf16, #tpu.memory_space<vmem>>, %arg9: memref<1x32xf32, #tpu.memory_space<vmem>>, %arg10: memref<32x128xbf16, #tpu.memory_space<vmem>>, %arg11: memref<1x128xf32, #tpu.memory_space<vmem>>, %arg12: memref<16x128xf32, #tpu.memory_space<vmem>>, %arg13: memref<2x2x32xf32, #tpu.memory_space<vmem>>) attributes {dimension_semantics = [#tpu.dimension_semantics<arbitrary>], iteration_bounds = array<i64: 1>, scalar_prefetch = 0 : i64, scratch_operands = 0 : i64, tpu.core_type = #tpu.core_type<tc>, window_params = [{pipeline_mode = #tpu.pipeline_mode<synchronous>, transform_indices = @transform_0, window_bounds = array<i64: 16, 1>}, {pipeline_mode = #tpu.pipeline_mode<synchronous>, transform_indices = @transform_1, window_bounds = array<i64: 2, 2, 32>}, {pipeline_mode = #tpu.pipeline_mode<synchronous>, transform_indices = @transform_2, window_bounds = array<i64: 128, 32>}, {pipeline_mode = #tpu.pipeline_mode<synchronous>, transform_indices = @transform_3, window_bounds = array<i64: 32, 32>}, {pipeline_mode = #tpu.pipeline_mode<synchronous>, transform_indices = @transform_4, window_bounds = array<i64: 32, 32>}, {pipeline_mode = #tpu.pipeline_mode<synchronous>, transform_indices = @transform_5, window_bounds = array<i64: 1, 32>}, {pipeline_mode = #tpu.pipeline_mode<synchronous>, transform_indices = @transform_6, window_bounds = array<i64: 32, 32>}, {pipeline_mode = #tpu.pipeline_mode<synchronous>, transform_indices = @transform_7, window_bounds = array<i64: 32, 32>}, {pipeline_mode = #tpu.pipeline_mode<synchronous>, transform_indices = @transform_8, window_bounds = array<i64: 1, 32>}, {pipeline_mode = #tpu.pipeline_mode<synchronous>, transform_indices = @transform_9, window_bounds = array<i64: 32, 128>}, {pipeline_mode = #tpu.pipeline_mode<synchronous>, transform_indices = @transform_10, window_bounds = array<i64: 1, 128>}, {pipeline_mode = #tpu.pipeline_mode<synchronous>, transform_indices = @transform_11, window_bounds = array<i64: 16, 128>}, {pipeline_mode = #tpu.pipeline_mode<synchronous>, transform_indices = @transform_12, window_bounds = array<i64: 2, 2, 32>}]} {
    %c0 = arith.constant 0 : index
    %c0_0 = arith.constant 0 : index
    %0 = vector.load %arg1[%c0, %c0_0] : memref<16x1xi32, #tpu.memory_space<vmem>>, vector<16x1xi32>
    %1 = tpu.iota {dimensions = array<i32: 1>} : vector<16x128xi32>
    %2 = vector.broadcast %0 : vector<16x1xi32> to vector<16x128xi32>
    %3 = arith.cmpi eq, %1, %2 : vector<16x128xi32>
    %cst = arith.constant 1.000000e+00 : f32
    %cst_1 = arith.constant 0.000000e+00 : f32
    %4 = vector.broadcast %cst : f32 to vector<16x128xf32>
    %5 = vector.broadcast %cst_1 : f32 to vector<16x128xf32>
    %6 = arith.select %3, %4, %5 : vector<16x128xi1>, vector<16x128xf32>
    %7 = arith.truncf %6 : vector<16x128xf32> to vector<16x128xbf16>
    %c0_2 = arith.constant 0 : index
    %c0_3 = arith.constant 0 : index
    %8 = vector.load %arg3[%c0_2, %c0_3] : memref<128x32xbf16, #tpu.memory_space<vmem>>, vector<128x32xbf16>
    %cst_4 = arith.constant dense<0.000000e+00> : vector<16x32xf32>
    %9 = tpu.matmul %7, %8, %cst_4 {dimension_numbers = #tpu.dot_dimension_numbers<[1], [0], [0], [1], [0, 0, 1, 1], [], []>} : vector<16x128xbf16>, vector<128x32xbf16>, vector<16x32xf32> -> vector<16x32xf32>
    %c0_5 = arith.constant 0 : index
    %c0_6 = arith.constant 0 : index
    %10 = vector.load %arg4[%c0_5, %c0_6] : memref<32x32xbf16, #tpu.memory_space<vmem>>, vector<32x32xbf16>
    %c0_7 = arith.constant 0 : index
    %c0_8 = arith.constant 0 : index
    %11 = vector.load %arg7[%c0_7, %c0_8] : memref<32x32xbf16, #tpu.memory_space<vmem>>, vector<32x32xbf16>
    %c0_9 = arith.constant 0 : index
    %c0_10 = arith.constant 0 : index
    %12 = vector.load %arg5[%c0_9, %c0_10] : memref<32x32xbf16, #tpu.memory_space<vmem>>, vector<32x32xbf16>
    %c0_11 = arith.constant 0 : index
    %c0_12 = arith.constant 0 : index
    %13 = vector.load %arg8[%c0_11, %c0_12] : memref<32x32xbf16, #tpu.memory_space<vmem>>, vector<32x32xbf16>
    %c0_13 = arith.constant 0 : index
    %c0_14 = arith.constant 0 : index
    %14 = vector.load %arg6[%c0_13, %c0_14] : memref<1x32xf32, #tpu.memory_space<vmem>>, vector<1x32xf32>
    %c0_15 = arith.constant 0 : index
    %c0_16 = arith.constant 0 : index
    %15 = vector.load %arg9[%c0_15, %c0_16] : memref<1x32xf32, #tpu.memory_space<vmem>>, vector<1x32xf32>
    %16 = arith.truncf %9 : vector<16x32xf32> to vector<16x32xbf16>
    %cst_17 = arith.constant dense<0.000000e+00> : vector<16x32xf32>
    %17 = tpu.matmul %16, %10, %cst_17 {dimension_numbers = #tpu.dot_dimension_numbers<[1], [0], [0], [1], [0, 0, 1, 1], [], []>} : vector<16x32xbf16>, vector<32x32xbf16>, vector<16x32xf32> -> vector<16x32xf32>
    %18 = vector.broadcast %14 : vector<1x32xf32> to vector<16x32xf32>
    %19 = arith.addf %17, %18 : vector<16x32xf32>
    %c0_18 = arith.constant 0 : index
    %c0_19 = arith.constant 0 : index
    %c0_20 = arith.constant 0 : index
    %20 = vector.load %arg2[%c0_18, %c0_19, %c0_20] : memref<2x2x32xf32, #tpu.memory_space<vmem>>, vector<1x2x32xf32>
    %21 = vector.shape_cast %20 : vector<1x2x32xf32> to vector<2x32xf32>
    %22 = arith.truncf %21 : vector<2x32xf32> to vector<2x32xbf16>
    %c1 = arith.constant 1 : index
    %c0_21 = arith.constant 0 : index
    %c0_22 = arith.constant 0 : index
    %23 = vector.load %arg2[%c1, %c0_21, %c0_22] : memref<2x2x32xf32, #tpu.memory_space<vmem>>, vector<1x2x32xf32>
    %24 = vector.shape_cast %23 : vector<1x2x32xf32> to vector<2x32xf32>
    %25 = arith.truncf %24 : vector<2x32xf32> to vector<2x32xbf16>
    %26 = vector.extract_strided_slice %19 {offsets = [0, 0], sizes = [2, 32], strides = [1, 1]} : vector<16x32xf32> to vector<2x32xf32>
    %cst_23 = arith.constant dense<0.000000e+00> : vector<2x32xf32>
    %27 = tpu.matmul %22, %12, %cst_23 {dimension_numbers = #tpu.dot_dimension_numbers<[1], [0], [0], [1], [0, 0, 1, 1], [], []>} : vector<2x32xbf16>, vector<32x32xbf16>, vector<2x32xf32> -> vector<2x32xf32>
    %28 = arith.addf %26, %27 : vector<2x32xf32>
    %29 = math.tanh %28 : vector<2x32xf32>
    %30 = arith.truncf %29 : vector<2x32xf32> to vector<2x32xbf16>
    %31 = vector.extract_strided_slice %19 {offsets = [2, 0], sizes = [2, 32], strides = [1, 1]} : vector<16x32xf32> to vector<2x32xf32>
    %cst_24 = arith.constant dense<0.000000e+00> : vector<2x32xf32>
    %32 = tpu.matmul %30, %12, %cst_24 {dimension_numbers = #tpu.dot_dimension_numbers<[1], [0], [0], [1], [0, 0, 1, 1], [], []>} : vector<2x32xbf16>, vector<32x32xbf16>, vector<2x32xf32> -> vector<2x32xf32>
    %33 = arith.addf %31, %32 : vector<2x32xf32>
    %34 = math.tanh %33 : vector<2x32xf32>
    %35 = arith.truncf %34 : vector<2x32xf32> to vector<2x32xbf16>
    %cst_25 = arith.constant dense<0.000000e+00> : vector<2x32xf32>
    %36 = tpu.matmul %30, %11, %cst_25 {dimension_numbers = #tpu.dot_dimension_numbers<[1], [0], [0], [1], [0, 0, 1, 1], [], []>} : vector<2x32xbf16>, vector<32x32xbf16>, vector<2x32xf32> -> vector<2x32xf32>
    %cst_26 = arith.constant dense<0.000000e+00> : vector<2x32xf32>
    %37 = tpu.matmul %25, %13, %cst_26 {dimension_numbers = #tpu.dot_dimension_numbers<[1], [0], [0], [1], [0, 0, 1, 1], [], []>} : vector<2x32xbf16>, vector<32x32xbf16>, vector<2x32xf32> -> vector<2x32xf32>
    %38 = arith.addf %36, %37 : vector<2x32xf32>
    %39 = vector.broadcast %15 : vector<1x32xf32> to vector<2x32xf32>
    %40 = arith.addf %38, %39 : vector<2x32xf32>
    %41 = math.tanh %40 : vector<2x32xf32>
    %42 = arith.truncf %41 : vector<2x32xf32> to vector<2x32xbf16>
    %43 = vector.extract_strided_slice %19 {offsets = [4, 0], sizes = [2, 32], strides = [1, 1]} : vector<16x32xf32> to vector<2x32xf32>
    %cst_27 = arith.constant dense<0.000000e+00> : vector<2x32xf32>
    %44 = tpu.matmul %35, %12, %cst_27 {dimension_numbers = #tpu.dot_dimension_numbers<[1], [0], [0], [1], [0, 0, 1, 1], [], []>} : vector<2x32xbf16>, vector<32x32xbf16>, vector<2x32xf32> -> vector<2x32xf32>
    %45 = arith.addf %43, %44 : vector<2x32xf32>
    %46 = math.tanh %45 : vector<2x32xf32>
    %47 = arith.truncf %46 : vector<2x32xf32> to vector<2x32xbf16>
    %cst_28 = arith.constant dense<0.000000e+00> : vector<2x32xf32>
    %48 = tpu.matmul %35, %11, %cst_28 {dimension_numbers = #tpu.dot_dimension_numbers<[1], [0], [0], [1], [0, 0, 1, 1], [], []>} : vector<2x32xbf16>, vector<32x32xbf16>, vector<2x32xf32> -> vector<2x32xf32>
    %cst_29 = arith.constant dense<0.000000e+00> : vector<2x32xf32>
    %49 = tpu.matmul %42, %13, %cst_29 {dimension_numbers = #tpu.dot_dimension_numbers<[1], [0], [0], [1], [0, 0, 1, 1], [], []>} : vector<2x32xbf16>, vector<32x32xbf16>, vector<2x32xf32> -> vector<2x32xf32>
    %50 = arith.addf %48, %49 : vector<2x32xf32>
    %51 = vector.broadcast %15 : vector<1x32xf32> to vector<2x32xf32>
    %52 = arith.addf %50, %51 : vector<2x32xf32>
    %53 = math.tanh %52 : vector<2x32xf32>
    %54 = arith.truncf %53 : vector<2x32xf32> to vector<2x32xbf16>
    %55 = vector.extract_strided_slice %19 {offsets = [6, 0], sizes = [2, 32], strides = [1, 1]} : vector<16x32xf32> to vector<2x32xf32>
    %cst_30 = arith.constant dense<0.000000e+00> : vector<2x32xf32>
    %56 = tpu.matmul %47, %12, %cst_30 {dimension_numbers = #tpu.dot_dimension_numbers<[1], [0], [0], [1], [0, 0, 1, 1], [], []>} : vector<2x32xbf16>, vector<32x32xbf16>, vector<2x32xf32> -> vector<2x32xf32>
    %57 = arith.addf %55, %56 : vector<2x32xf32>
    %58 = math.tanh %57 : vector<2x32xf32>
    %59 = arith.truncf %58 : vector<2x32xf32> to vector<2x32xbf16>
    %cst_31 = arith.constant dense<0.000000e+00> : vector<2x32xf32>
    %60 = tpu.matmul %47, %11, %cst_31 {dimension_numbers = #tpu.dot_dimension_numbers<[1], [0], [0], [1], [0, 0, 1, 1], [], []>} : vector<2x32xbf16>, vector<32x32xbf16>, vector<2x32xf32> -> vector<2x32xf32>
    %cst_32 = arith.constant dense<0.000000e+00> : vector<2x32xf32>
    %61 = tpu.matmul %54, %13, %cst_32 {dimension_numbers = #tpu.dot_dimension_numbers<[1], [0], [0], [1], [0, 0, 1, 1], [], []>} : vector<2x32xbf16>, vector<32x32xbf16>, vector<2x32xf32> -> vector<2x32xf32>
    %62 = arith.addf %60, %61 : vector<2x32xf32>
    %63 = vector.broadcast %15 : vector<1x32xf32> to vector<2x32xf32>
    %64 = arith.addf %62, %63 : vector<2x32xf32>
    %65 = math.tanh %64 : vector<2x32xf32>
    %66 = arith.truncf %65 : vector<2x32xf32> to vector<2x32xbf16>
    %67 = vector.extract_strided_slice %19 {offsets = [8, 0], sizes = [2, 32], strides = [1, 1]} : vector<16x32xf32> to vector<2x32xf32>
    %cst_33 = arith.constant dense<0.000000e+00> : vector<2x32xf32>
    %68 = tpu.matmul %59, %12, %cst_33 {dimension_numbers = #tpu.dot_dimension_numbers<[1], [0], [0], [1], [0, 0, 1, 1], [], []>} : vector<2x32xbf16>, vector<32x32xbf16>, vector<2x32xf32> -> vector<2x32xf32>
    %69 = arith.addf %67, %68 : vector<2x32xf32>
    %70 = math.tanh %69 : vector<2x32xf32>
    %71 = arith.truncf %70 : vector<2x32xf32> to vector<2x32xbf16>
    %cst_34 = arith.constant dense<0.000000e+00> : vector<2x32xf32>
    %72 = tpu.matmul %59, %11, %cst_34 {dimension_numbers = #tpu.dot_dimension_numbers<[1], [0], [0], [1], [0, 0, 1, 1], [], []>} : vector<2x32xbf16>, vector<32x32xbf16>, vector<2x32xf32> -> vector<2x32xf32>
    %cst_35 = arith.constant dense<0.000000e+00> : vector<2x32xf32>
    %73 = tpu.matmul %66, %13, %cst_35 {dimension_numbers = #tpu.dot_dimension_numbers<[1], [0], [0], [1], [0, 0, 1, 1], [], []>} : vector<2x32xbf16>, vector<32x32xbf16>, vector<2x32xf32> -> vector<2x32xf32>
    %74 = arith.addf %72, %73 : vector<2x32xf32>
    %75 = vector.broadcast %15 : vector<1x32xf32> to vector<2x32xf32>
    %76 = arith.addf %74, %75 : vector<2x32xf32>
    %77 = math.tanh %76 : vector<2x32xf32>
    %78 = arith.truncf %77 : vector<2x32xf32> to vector<2x32xbf16>
    %79 = vector.extract_strided_slice %19 {offsets = [10, 0], sizes = [2, 32], strides = [1, 1]} : vector<16x32xf32> to vector<2x32xf32>
    %cst_36 = arith.constant dense<0.000000e+00> : vector<2x32xf32>
    %80 = tpu.matmul %71, %12, %cst_36 {dimension_numbers = #tpu.dot_dimension_numbers<[1], [0], [0], [1], [0, 0, 1, 1], [], []>} : vector<2x32xbf16>, vector<32x32xbf16>, vector<2x32xf32> -> vector<2x32xf32>
    %81 = arith.addf %79, %80 : vector<2x32xf32>
    %82 = math.tanh %81 : vector<2x32xf32>
    %83 = arith.truncf %82 : vector<2x32xf32> to vector<2x32xbf16>
    %cst_37 = arith.constant dense<0.000000e+00> : vector<2x32xf32>
    %84 = tpu.matmul %71, %11, %cst_37 {dimension_numbers = #tpu.dot_dimension_numbers<[1], [0], [0], [1], [0, 0, 1, 1], [], []>} : vector<2x32xbf16>, vector<32x32xbf16>, vector<2x32xf32> -> vector<2x32xf32>
    %cst_38 = arith.constant dense<0.000000e+00> : vector<2x32xf32>
    %85 = tpu.matmul %78, %13, %cst_38 {dimension_numbers = #tpu.dot_dimension_numbers<[1], [0], [0], [1], [0, 0, 1, 1], [], []>} : vector<2x32xbf16>, vector<32x32xbf16>, vector<2x32xf32> -> vector<2x32xf32>
    %86 = arith.addf %84, %85 : vector<2x32xf32>
    %87 = vector.broadcast %15 : vector<1x32xf32> to vector<2x32xf32>
    %88 = arith.addf %86, %87 : vector<2x32xf32>
    %89 = math.tanh %88 : vector<2x32xf32>
    %90 = arith.truncf %89 : vector<2x32xf32> to vector<2x32xbf16>
    %91 = vector.extract_strided_slice %19 {offsets = [12, 0], sizes = [2, 32], strides = [1, 1]} : vector<16x32xf32> to vector<2x32xf32>
    %cst_39 = arith.constant dense<0.000000e+00> : vector<2x32xf32>
    %92 = tpu.matmul %83, %12, %cst_39 {dimension_numbers = #tpu.dot_dimension_numbers<[1], [0], [0], [1], [0, 0, 1, 1], [], []>} : vector<2x32xbf16>, vector<32x32xbf16>, vector<2x32xf32> -> vector<2x32xf32>
    %93 = arith.addf %91, %92 : vector<2x32xf32>
    %94 = math.tanh %93 : vector<2x32xf32>
    %95 = arith.truncf %94 : vector<2x32xf32> to vector<2x32xbf16>
    %cst_40 = arith.constant dense<0.000000e+00> : vector<2x32xf32>
    %96 = tpu.matmul %83, %11, %cst_40 {dimension_numbers = #tpu.dot_dimension_numbers<[1], [0], [0], [1], [0, 0, 1, 1], [], []>} : vector<2x32xbf16>, vector<32x32xbf16>, vector<2x32xf32> -> vector<2x32xf32>
    %cst_41 = arith.constant dense<0.000000e+00> : vector<2x32xf32>
    %97 = tpu.matmul %90, %13, %cst_41 {dimension_numbers = #tpu.dot_dimension_numbers<[1], [0], [0], [1], [0, 0, 1, 1], [], []>} : vector<2x32xbf16>, vector<32x32xbf16>, vector<2x32xf32> -> vector<2x32xf32>
    %98 = arith.addf %96, %97 : vector<2x32xf32>
    %99 = vector.broadcast %15 : vector<1x32xf32> to vector<2x32xf32>
    %100 = arith.addf %98, %99 : vector<2x32xf32>
    %101 = math.tanh %100 : vector<2x32xf32>
    %102 = arith.truncf %101 : vector<2x32xf32> to vector<2x32xbf16>
    %103 = vector.extract_strided_slice %19 {offsets = [14, 0], sizes = [2, 32], strides = [1, 1]} : vector<16x32xf32> to vector<2x32xf32>
    %cst_42 = arith.constant dense<0.000000e+00> : vector<2x32xf32>
    %104 = tpu.matmul %95, %12, %cst_42 {dimension_numbers = #tpu.dot_dimension_numbers<[1], [0], [0], [1], [0, 0, 1, 1], [], []>} : vector<2x32xbf16>, vector<32x32xbf16>, vector<2x32xf32> -> vector<2x32xf32>
    %105 = arith.addf %103, %104 : vector<2x32xf32>
    %106 = math.tanh %105 : vector<2x32xf32>
    %107 = arith.truncf %106 : vector<2x32xf32> to vector<2x32xbf16>
    %cst_43 = arith.constant dense<0.000000e+00> : vector<2x32xf32>
    %108 = tpu.matmul %95, %11, %cst_43 {dimension_numbers = #tpu.dot_dimension_numbers<[1], [0], [0], [1], [0, 0, 1, 1], [], []>} : vector<2x32xbf16>, vector<32x32xbf16>, vector<2x32xf32> -> vector<2x32xf32>
    %cst_44 = arith.constant dense<0.000000e+00> : vector<2x32xf32>
    %109 = tpu.matmul %102, %13, %cst_44 {dimension_numbers = #tpu.dot_dimension_numbers<[1], [0], [0], [1], [0, 0, 1, 1], [], []>} : vector<2x32xbf16>, vector<32x32xbf16>, vector<2x32xf32> -> vector<2x32xf32>
    %110 = arith.addf %108, %109 : vector<2x32xf32>
    %111 = vector.broadcast %15 : vector<1x32xf32> to vector<2x32xf32>
    %112 = arith.addf %110, %111 : vector<2x32xf32>
    %113 = math.tanh %112 : vector<2x32xf32>
    %114 = arith.truncf %113 : vector<2x32xf32> to vector<2x32xbf16>
    %cst_45 = arith.constant dense<0.000000e+00> : vector<2x32xf32>
    %115 = tpu.matmul %107, %11, %cst_45 {dimension_numbers = #tpu.dot_dimension_numbers<[1], [0], [0], [1], [0, 0, 1, 1], [], []>} : vector<2x32xbf16>, vector<32x32xbf16>, vector<2x32xf32> -> vector<2x32xf32>
    %cst_46 = arith.constant dense<0.000000e+00> : vector<2x32xf32>
    %116 = tpu.matmul %114, %13, %cst_46 {dimension_numbers = #tpu.dot_dimension_numbers<[1], [0], [0], [1], [0, 0, 1, 1], [], []>} : vector<2x32xbf16>, vector<32x32xbf16>, vector<2x32xf32> -> vector<2x32xf32>
    %117 = arith.addf %115, %116 : vector<2x32xf32>
    %118 = vector.broadcast %15 : vector<1x32xf32> to vector<2x32xf32>
    %119 = arith.addf %117, %118 : vector<2x32xf32>
    %120 = math.tanh %119 : vector<2x32xf32>
    %121 = arith.truncf %120 : vector<2x32xf32> to vector<2x32xbf16>
    %122 = tpu.concatenate %42, %54, %66, %78, %90, %102, %114, %121 in 0 : vector<2x32xbf16>, vector<2x32xbf16>, vector<2x32xbf16>, vector<2x32xbf16>, vector<2x32xbf16>, vector<2x32xbf16>, vector<2x32xbf16>, vector<2x32xbf16> -> vector<16x32xbf16>
    %c0_47 = arith.constant 0 : index
    %c0_48 = arith.constant 0 : index
    %123 = vector.load %arg10[%c0_47, %c0_48] : memref<32x128xbf16, #tpu.memory_space<vmem>>, vector<32x128xbf16>
    %cst_49 = arith.constant dense<0.000000e+00> : vector<16x128xf32>
    %124 = tpu.matmul %122, %123, %cst_49 {dimension_numbers = #tpu.dot_dimension_numbers<[1], [0], [0], [1], [0, 0, 1, 1], [], []>} : vector<16x32xbf16>, vector<32x128xbf16>, vector<16x128xf32> -> vector<16x128xf32>
    %c0_50 = arith.constant 0 : index
    %c0_51 = arith.constant 0 : index
    %125 = vector.load %arg11[%c0_50, %c0_51] : memref<1x128xf32, #tpu.memory_space<vmem>>, vector<1x128xf32>
    %126 = vector.broadcast %125 : vector<1x128xf32> to vector<16x128xf32>
    %127 = arith.addf %124, %126 : vector<16x128xf32>
    %c0_52 = arith.constant 0 : index
    %c0_53 = arith.constant 0 : index
    %128 = vector.load %arg12[%c0_52, %c0_53] : memref<16x128xf32, #tpu.memory_space<vmem>>, vector<16x128xf32>
    tpu.vector_store %arg12[%c0_52, %c0_53], %127 {strides = array<i32>} : memref<16x128xf32, #tpu.memory_space<vmem>>, vector<16x128xf32>,
    %c0_54 = arith.constant 0 : index
    %c0_55 = arith.constant 0 : index
    %c0_56 = arith.constant 0 : index
    %129 = vector.load %arg13[%c0_54, %c0_55, %c0_56] : memref<2x2x32xf32, #tpu.memory_space<vmem>>, vector<1x2x32xf32>
    %130 = vector.shape_cast %129 : vector<1x2x32xf32> to vector<2x32xf32>
    %131 = vector.shape_cast %106 : vector<2x32xf32> to vector<1x2x32xf32>
    tpu.vector_store %arg13[%c0_54, %c0_55, %c0_56], %131 {strides = array<i32>} : memref<2x2x32xf32, #tpu.memory_space<vmem>>, vector<1x2x32xf32>,
    %c1_57 = arith.constant 1 : index
    %c0_58 = arith.constant 0 : index
    %c0_59 = arith.constant 0 : index
    %132 = vector.load %arg13[%c1_57, %c0_58, %c0_59] : memref<2x2x32xf32, #tpu.memory_space<vmem>>, vector<1x2x32xf32>
    %133 = vector.shape_cast %132 : vector<1x2x32xf32> to vector<2x32xf32>
    %134 = vector.shape_cast %120 : vector<2x32xf32> to vector<1x2x32xf32>
    tpu.vector_store %arg13[%c1_57, %c0_58, %c0_59], %134 {strides = array<i32>} : memref<2x2x32xf32, #tpu.memory_space<vmem>>, vector<1x2x32xf32>,
    return
  }
  func.func @transform_0(%arg0: i32) -> (i32, i32) {
    %c0_i32 = arith.constant 0 : i32
    %c0_i32_0 = arith.constant 0 : i32
    %c0_i32_1 = arith.constant 0 : i32
    return %c0_i32, %c0_i32_0 : i32, i32
  }
  func.func @transform_1(%arg0: i32) -> (i32, i32, i32) {
    %c0_i32 = arith.constant 0 : i32
    %c0_i32_0 = arith.constant 0 : i32
    %c0_i32_1 = arith.constant 0 : i32
    %c0_i32_2 = arith.constant 0 : i32
    return %c0_i32, %c0_i32_0, %c0_i32_1 : i32, i32, i32
  }
  func.func @transform_2(%arg0: i32) -> (i32, i32) {
    %c0_i32 = arith.constant 0 : i32
    %c0_i32_0 = arith.constant 0 : i32
    %c0_i32_1 = arith.constant 0 : i32
    return %c0_i32, %c0_i32_0 : i32, i32
  }
  func.func @transform_3(%arg0: i32) -> (i32, i32) {
    %c0_i32 = arith.constant 0 : i32
    %c0_i32_0 = arith.constant 0 : i32
    %c0_i32_1 = arith.constant 0 : i32
    return %c0_i32, %c0_i32_0 : i32, i32
  }
  func.func @transform_4(%arg0: i32) -> (i32, i32) {
    %c0_i32 = arith.constant 0 : i32
    %c0_i32_0 = arith.constant 0 : i32
    %c0_i32_1 = arith.constant 0 : i32
    return %c0_i32, %c0_i32_0 : i32, i32
  }
  func.func @transform_5(%arg0: i32) -> (i32, i32) {
    %c0_i32 = arith.constant 0 : i32
    %c0_i32_0 = arith.constant 0 : i32
    %c0_i32_1 = arith.constant 0 : i32
    return %c0_i32, %c0_i32_0 : i32, i32
  }
  func.func @transform_6(%arg0: i32) -> (i32, i32) {
    %c0_i32 = arith.constant 0 : i32
    %c0_i32_0 = arith.constant 0 : i32
    %c0_i32_1 = arith.constant 0 : i32
    return %c0_i32, %c0_i32_0 : i32, i32
  }
  func.func @transform_7(%arg0: i32) -> (i32, i32) {
    %c0_i32 = arith.constant 0 : i32
    %c0_i32_0 = arith.constant 0 : i32
    %c0_i32_1 = arith.constant 0 : i32
    return %c0_i32, %c0_i32_0 : i32, i32
  }
  func.func @transform_8(%arg0: i32) -> (i32, i32) {
    %c0_i32 = arith.constant 0 : i32
    %c0_i32_0 = arith.constant 0 : i32
    %c0_i32_1 = arith.constant 0 : i32
    return %c0_i32, %c0_i32_0 : i32, i32
  }
  func.func @transform_9(%arg0: i32) -> (i32, i32) {
    %c0_i32 = arith.constant 0 : i32
    %c0_i32_0 = arith.constant 0 : i32
    %c0_i32_1 = arith.constant 0 : i32
    return %c0_i32, %c0_i32_0 : i32, i32
  }
  func.func @transform_10(%arg0: i32) -> (i32, i32) {
    %c0_i32 = arith.constant 0 : i32
    %c0_i32_0 = arith.constant 0 : i32
    %c0_i32_1 = arith.constant 0 : i32
    return %c0_i32, %c0_i32_0 : i32, i32
  }
  func.func @transform_11(%arg0: i32) -> (i32, i32) {
    %c0_i32 = arith.constant 0 : i32
    %c0_i32_0 = arith.constant 0 : i32
    %c0_i32_1 = arith.constant 0 : i32
    return %c0_i32, %c0_i32_0 : i32, i32
  }
  func.func @transform_12(%arg0: i32) -> (i32, i32, i32) {
    %c0_i32 = arith.constant 0 : i32
    %c0_i32_0 = arith.constant 0 : i32
    %c0_i32_1 = arith.constant 0 : i32
    %c0_i32_2 = arith.constant 0 : i32
    return %c0_i32, %c0_i32_0, %c0_i32_1 : i32, i32, i32
  }
}

</mosaic_0001>

<bundles_post_ra>
// kernel: tpu_custom_call.1
= control target key start
LH: loop header
LB: loop body
LE: loop exit
PB: predicated region body
PF: predicated region fallthrough
CT: control target
= control target key end

     0   :  { %18 = vsyncpa [#allocation3], 0  ;;  %v1991_v1 = vmov 0   ;;  %v1992_v2 = vmov 0.0   ;;  %vm1993_vm0 = vmmov 0   ;;  %s2373_s0 = inlined_call_operand.vmem [shape: s32[16,1], index: 0, kind: input, shape index: {}]   ;;  %s2374_s1 = inlined_call_operand.vmem [shape: f32[2,2,32], index: 1, kind: input, shape index: {}]   ;;  %s2375_s2 = inlined_call_operand.vmem [shape: bf16[128,32], index: 2, kind: input, shape index: {}]   ;;  %s2376_s3 = inlined_call_operand.vmem [shape: bf16[32,32], index: 3, kind: input, shape index: {}]   ;;  %s2377_s4 = inlined_call_operand.vmem [shape: bf16[32,32], index: 4, kind: input, shape index: {}]   ;;  %s2378_s5 = inlined_call_operand.vmem [shape: f32[1,32], index: 5, kind: input, shape index: {}]   ;;  %s2379_s6 = inlined_call_operand.vmem [shape: bf16[32,32], index: 6, kind: input, shape index: {}]   ;;  %s2380_s7 = inlined_call_operand.vmem [shape: bf16[32,32], index: 7, kind: input, shape index: {}]   ;;  %s2381_s8 = inlined_call_operand.vmem [shape: f32[1,32], index: 8, kind: input, shape index: {}]   ;;  %s2382_s9 = inlined_call_operand.vmem [shape: bf16[32,128], index: 9, kind: input, shape index: {}]   ;;  %s2383_s10 = inlined_call_operand.vmem [shape: f32[1,128], index: 10, kind: input, shape index: {}]   ;;  %s2384_s11 = inlined_call_operand.hbm [shape: f32[16,128], index: 11, kind: output, shape index: {0}]   ;;  %s2385_s12 = inlined_call_operand.hbm [shape: f32[2,2,32], index: 12, kind: output, shape index: {1}]  }
   0x1   :  { %v43_v0 = vld [vmem:[%s2373_s0] sm:$0xff]  ;;  %1896 = vset.pattern.permute.xlu0 %v1991_v1  ;;  %1658 = vmatprep.subr.bf16.mxu0 %v1992_v2  ;;  %v1897_v3 = vld [vmem:[%s2375_s2 + $0x38] sm:$0xff]   ;;  %v44_v4 = vld [vmem:[%s2373_s0 + $0x8] sm:$0xff] }
   0x2   :  { %48 = vperm.xlu0 %1896, %v43_v0   ;;  %1678 = vmatprep.subr.bf16.mxu1 %v1992_v2  ;;  %v1898_v5 = vld [vmem:[%s2375_s2 + $0x30] sm:$0xff]   ;;  %v1899_v6 = vld [vmem:[%s2375_s2 + $0x28] sm:$0xff]   ;;  %v1900_v8 = vld [vmem:[%s2375_s2 + $0x20] sm:$0xff]  }
   0x3   :  { %1659 = vmatpush3.bf16.msra.mxu0 %v1897_v3  ;;  %1674 = vmatprep.mubr.msk.bf16.mxu0 %vm1993_vm0, %v1992_v2  ;;  %v1905_v7 = vld [vmem:[%s2376_s3 + $0x8] sm:$0xff]   ;;  %v1901_v9 = vld [vmem:[%s2375_s2 + $0x18] sm:$0xff]  }
   0x4   :  { %1660 = vmatprep.subr.bf16.mxu0 %v1992_v2  ;;  %1682 = vmatprep.mubr.msk.bf16.mxu1 %vm1993_vm0, %v1992_v2 }
   0x5   :  { %1679 = vmatpush3.bf16.msra.mxu1 %v1905_v7 }
   0x6   :  { %51 = vperm.xlu0 %1896, %v44_v4   ;;  %1680 = vmatprep.subr.bf16.mxu1 %v1992_v2 }
   0x7   :  { %1661 = vmatpush3.bf16.msra.mxu0 %v1898_v5 }
   0x8   :  { %1662 = vmatprep.subr.bf16.mxu0 %v1992_v2 }
   0xb   :  { %1663 = vmatpush3.bf16.msra.mxu0 %v1899_v6 }
   0xc   :  { %1664 = vmatprep.subr.bf16.mxu0 %v1992_v2 }
   0xf   :  { %1665 = vmatpush3.bf16.msra.mxu0 %v1900_v8 }
  0x10   :  { %19 = vsyncpa [#allocation5], 0  ;;  %1666 = vmatprep.subr.bf16.mxu0 %v1992_v2  ;;  %v1902_v10 = vld [vmem:[%s2375_s2 + $0x10] sm:$0xff]   ;;  %v1903_v11 = vld [vmem:[%s2375_s2 + $0x8] sm:$0xff]   ;;  %v45_v13 = vlaneseq  ;;  %v1994_v17 = vmov 1.0|1.0  }
  0x11   :  { %v1904_v12 = vld [vmem:[%s2375_s2] sm:$0xff]   ;;  %vm200_vm4 = vcmask 261120   ;;  %v2123_v22 = vld [vmem:[%s2377_s4 + $0x8] sm:$0xff]   ;;  %vm1395_vm5 = vcmask 1040384   ;;  %vm1398_vm6 = vcmask 1041408   ;;  %vm1401_vm7 = vcmask 1042432  }
  0x12   :  { %v46_v15 = vand.u32 127, %v45_v13  ;;  %v1906_v18 = vld [vmem:[%s2376_s3] sm:$0xff]   ;;  %v2150_v28 = vld [vmem:[%s2379_s6 + $0x8] sm:$0xff]   ;;  %vm1404_vm8 = vcmask 1043456   ;;  %vm1407_vm9 = vcmask 1044480   ;;  %vm1484_vm10 = vcmask 261126  }
  0x13   :  { %1667 = vmatpush3.bf16.msra.mxu0 %v1901_v9  ;;  %1681 = vmatpush3.bf16.msra.mxu1 %v1906_v18  ;;  %v2130_v25 = vld [vmem:[%s2377_s4] sm:$0xff]   ;;  %v2172_v43 = vld [vmem:[%s2380_s7 + $0x8] sm:$0xff]   ;;  %vm1410_vm11 = vcmask 1045504   ;;  %vm1487_vm12 = vcmask 254976   ;;  %vm1413_vm13 = vcmask 1046528  }
  0x14   :  { %1668 = vmatprep.subr.bf16.mxu0 %v1992_v2  ;;  %1686 = vmatprep.subr.bf16.mxu1 %v1992_v2  ;;  %v245_v26 = vld [vmem:[%s2374_s1] sm:$0x3]  ;;  %v1535_v46 = vld [vmem:[%s2374_s1 + $0x2] sm:$0x3] }
  0x15   :  { %v246_v27 = vpack.c.bf16 %v245_v26, %v245_v26  ;;  %v2157_v29 = vld [vmem:[%s2379_s6] sm:$0xff]   ;;  %v249_v47 = vpack.c.bf16 %v1535_v46, %v1535_v46 }
  0x16   :  { %v1531_v32 = vld [vmem:[%s2378_s5] ss:$0 sm:$0xff] }
  0x17   :  { %1669 = vmatpush3.bf16.msra.mxu0 %v1902_v10  ;;  %v2180_v45 = vld [vmem:[%s2380_s7] sm:$0xff]  }
  0x18   :  { %1670 = vmatprep.subr.bf16.mxu0 %v1992_v2  ;;  %v2207_v58 = vld [vmem:[%s2381_s8] ss:$0 sm:$0xff] }
  0x1b   :  { %1671 = vmatpush3.bf16.msra.mxu0 %v1903_v11 }
  0x1c   :  { %1672 = vmatprep.subr.bf16.mxu0 %v1992_v2 }
  0x1f   :  { %1673 = vmatpush3.bf16.msra.mxu0 %v1904_v12 }
  0x20   :  { %1710 = vmatprep.subr.bf16.mxu0 %v1992_v2 }
  0x7d   :  { %v49_v14 = vpop.permute.xlu0 %48 }
  0x7e   :  { %vm53_vm1 = vcmp.eq.s32.totalorder %v46_v15, %v49_v14 }
  0x81   :  { %v52_v16 = vpop.permute.xlu0 %51 }
  0x82   :  { %vm54_vm2 = vcmp.eq.s32.totalorder %v46_v15, %v52_v16 }
  0x83   :  { %vm1529_vm3 = vmpackc.low %vm54_vm2, %vm53_vm1 }
  0x84   :  { %1675 = vmatmul.mubr.msk.bf16.vlgmr.msra.gmra.mxu0 %vm1529_vm3, %v1994_v17 }
  0x85   :  { %1714 = vmatprep.mubr.msk.bf16.mxu0 %vm1993_vm0, %v1992_v2  ;;  %1711 = vmatpush3.bf16.msra.mxu0 %v2150_v28 }
  0x86   :  { %1712 = vmatprep.subr.bf16.mxu0 %v1992_v2 }
  0x89   :  { %1713 = vmatpush3.bf16.msra.mxu0 %v2157_v29 }
  0x8a   :  { %1726 = vmatprep.subr.bf16.mxu0 %v1992_v2 }
 0x144   :  { %v156_v19 = vpop.f32.mrf.mxu0 }
 0x146   :  { %v1676_v20 = vpop.f32.mrf.mxu0 }
 0x148   :  { %v159_v21 = vpop.f32.mrf.mxu0 }
 0x149   :  { %v181_v23 = vpack.c.bf16 %v159_v21, %v156_v19 }
 0x14a   :  { %v1677_v24 = vpop.f32.mrf.mxu0 }
 0x14b   :  { %1683 = vmatmul.mubr.msk.bf16.vlgmr.msra.gmra.mxu1 %vm200_vm4, %v181_v23 }
 0x14c   :  { %1687 = vmatpush3.bf16.msra.mxu1 %v2123_v22  ;;  %1690 = vmatprep.mubr.msk.bf16.mxu1 %vm1993_vm0, %v1992_v2 }
 0x14d   :  { %1688 = vmatprep.subr.bf16.mxu1 %v1992_v2 }
 0x150   :  { %1689 = vmatpush3.bf16.msra.mxu1 %v2130_v25 }
 0x151   :  { %1694 = vmatprep.subr.bf16.mxu1 %v1992_v2 }
 0x153   :  { %1691 = vmatmul.mubr.msk.bf16.vlgmr.msra.gmra.mxu1 %vm200_vm4, %v246_v27 }
 0x154   :  { %1695 = vmatpush3.bf16.msra.mxu1 %v2123_v22  ;;  %1698 = vmatprep.mubr.msk.bf16.mxu1 %vm1993_vm0, %v1992_v2 }
 0x155   :  { %1696 = vmatprep.subr.bf16.mxu1 %v1992_v2 }
 0x158   :  { %1697 = vmatpush3.bf16.msra.mxu1 %v2130_v25 }
 0x159   :  { %1702 = vmatprep.subr.bf16.mxu1 %v1992_v2 }
 0x20b   :  { %v238_v30 = vpop.f32.mrf.mxu1 }
 0x20c   :  { %v2166_v36 = vadd.f32 %v1531_v32, %v238_v30 }
 0x20d   :  { %v1684_v31 = vpop.f32.mrf.mxu1 }
 0x20f   :  { %v241_v33 = vpop.f32.mrf.mxu1 }
 0x210   :  { %v2164_v34 = vadd.f32 %v1531_v32, %v241_v33 }
 0x211   :  { %v1685_v35 = vpop.f32.mrf.mxu1 }
 0x213   :  { %v299_v37 = vpop.f32.mrf.mxu1 }
 0x214   :  { %v305_v38 = vadd.f32 %v299_v37, %v2166_v36 }
 0x215   :  { %v1692_v39 = vpop.f32.mrf.mxu1 }
 0x216   :  { %1915 = vtanh.f32 %v305_v38 }
 0x217   :  { %v302_v40 = vpop.f32.mrf.mxu1 }
 0x219   :  { %v1693_v41 = vpop.f32.mrf.mxu1 }
 0x223   :  { %v1916_v42 = vpop.eup %1915 }
 0x224   :  { %v307_v44 = vpack.c.bf16 %v1916_v42, %v1916_v42 }
 0x226   :  { %1699 = vmatmul.mubr.msk.bf16.vlgmr.msra.gmra.mxu1 %vm200_vm4, %v307_v44  ;;  %1715 = vmatmul.mubr.msk.bf16.vlgmr.msra.gmra.mxu0 %vm200_vm4, %v307_v44 }
 0x227   :  { %1703 = vmatpush3.bf16.msra.mxu1 %v2172_v43  ;;  %1706 = vmatprep.mubr.msk.bf16.mxu1 %vm1993_vm0, %v1992_v2 }
 0x228   :  { %1704 = vmatprep.subr.bf16.mxu1 %v1992_v2  ;;  %1727 = vmatpush3.bf16.msra.mxu0 %v2172_v43 }
 0x229   :  { %1728 = vmatprep.subr.bf16.mxu0 %v1992_v2  ;;  %1730 = vmatprep.mubr.msk.bf16.mxu0 %vm1993_vm0, %v1992_v2 }
 0x22b   :  { %1705 = vmatpush3.bf16.msra.mxu1 %v2180_v45 }
 0x22c   :  { %1718 = vmatprep.subr.bf16.mxu1 %v1992_v2  ;;  %1729 = vmatpush3.bf16.msra.mxu0 %v2180_v45 }
 0x22d   :  { %1742 = vmatprep.subr.bf16.mxu0 %v1992_v2 }
 0x22e   :  { %1707 = vmatmul.mubr.msk.bf16.vlgmr.msra.gmra.mxu1 %vm200_vm4, %v249_v47 }
 0x22f   :  { %1719 = vmatpush3.bf16.msra.mxu1 %v2123_v22  ;;  %1722 = vmatprep.mubr.msk.bf16.mxu1 %vm1993_vm0, %v1992_v2 }
 0x230   :  { %1720 = vmatprep.subr.bf16.mxu1 %v1992_v2 }
 0x233   :  { %1721 = vmatpush3.bf16.msra.mxu1 %v2130_v25 }
 0x234   :  { %1734 = vmatprep.subr.bf16.mxu1 %v1992_v2 }
 0x2e6   :  { %v345_v48 = vpop.f32.mrf.mxu1  ;;  %v458_v49 = vpop.f32.mrf.mxu0 }
 0x2e7   :  { %v352_v50 = vrot.slane %v345_v48, 6 }
 0x2e8   :  { %v1700_v51 = vpop.f32.mrf.mxu1  ;;  %v1716_v52 = vpop.f32.mrf.mxu0 }
 0x2e9   :  { %v354_v53 = vadd.f32 %v352_v50, %v2166_v36 }
 0x2ea   :  { %v348_v54 = vpop.f32.mrf.mxu1  ;;  %v461_v55 = vpop.f32.mrf.mxu0 }
 0x2eb   :  { %1917 = vtanh.f32 %v354_v53 }
 0x2ec   :  { %v1701_v56 = vpop.f32.mrf.mxu1  ;;  %v1717_v57 = vpop.f32.mrf.mxu0 }
 0x2ee   :  { %v406_v59 = vpop.f32.mrf.mxu1 }
 0x2ef   :  { %v459_v60 = vadd.f32 %v458_v49, %v406_v59 }
 0x2f0   :  { %v1708_v61 = vpop.f32.mrf.mxu1 }
 0x2f1   :  { %v470_v62 = vadd.f32 %v2207_v58, %v459_v60 }
 0x2f2   :  { %v409_v63 = vpop.f32.mrf.mxu1 }
 0x2f3   :  { %1919 = vtanh.f32 %v470_v62 }
 0x2f4   :  { %v1709_v0 = vpop.f32.mrf.mxu1 }
 0x2f8   :  { %v1918_v1 = vpop.eup %1917 }
 0x2f9   :  { %v356_v3 = vpack.c.bf16 %v1918_v1, %v1918_v1 }
 0x2fb   :  { %v474_v4 = vrot.slane %v356_v3, 1 }
 0x2fd   :  { %1723 = vmatmul.mubr.msk.bf16.vlgmr.msra.gmra.mxu1 %vm200_vm4, %v474_v4 }
 0x2fe   :  { %1735 = vmatpush3.bf16.msra.mxu1 %v2150_v28  ;;  %1738 = vmatprep.mubr.msk.bf16.mxu1 %vm1993_vm0, %v1992_v2 }
 0x2ff   :  { %1736 = vmatprep.subr.bf16.mxu1 %v1992_v2 }
 0x300   :  { %v1920_v5 = vpop.eup %1919 }
 0x301   :  { %v2215_v6 = vpack.c.bf16 %v1920_v5, %v1920_v5 }
 0x302   :  { %1737 = vmatpush3.bf16.msra.mxu1 %v2157_v29 }
 0x303   :  { %1731 = vmatmul.mubr.msk.bf16.vlgmr.msra.gmra.mxu0 %vm200_vm4, %v2215_v6  ;;  %1750 = vmatprep.subr.bf16.mxu1 %v1992_v2 }
 0x304   :  { %1743 = vmatpush3.bf16.msra.mxu0 %v2123_v22  ;;  %1746 = vmatprep.mubr.msk.bf16.mxu0 %vm1993_vm0, %v1992_v2 }
 0x305   :  { %1739 = vmatmul.mubr.msk.bf16.vlgmr.msra.gmra.mxu1 %vm200_vm4, %v474_v4  ;;  %1744 = vmatprep.subr.bf16.mxu0 %v1992_v2 }
 0x306   :  { %1751 = vmatpush3.bf16.msra.mxu1 %v2172_v43  ;;  %1754 = vmatprep.mubr.msk.bf16.mxu1 %vm1993_vm0, %v1992_v2 }
 0x307   :  { %1752 = vmatprep.subr.bf16.mxu1 %v1992_v2 }
 0x308   :  { %1745 = vmatpush3.bf16.msra.mxu0 %v2130_v25 }
 0x309   :  { %1758 = vmatprep.subr.bf16.mxu0 %v1992_v2 }
 0x30a   :  { %1753 = vmatpush3.bf16.msra.mxu1 %v2180_v45 }
 0x30b   :  { %1766 = vmatprep.subr.bf16.mxu1 %v1992_v2 }
 0x3bd   :  { %v512_v7 = vpop.f32.mrf.mxu1 }
 0x3be   :  { %v519_v8 = vrot.slane %v512_v7, 4 }
 0x3bf   :  { %v1724_v9 = vpop.f32.mrf.mxu1 }
 0x3c0   :  { %v521_v10 = vadd.f32 %v519_v8, %v2166_v36 }
 0x3c1   :  { %v515_v11 = vpop.f32.mrf.mxu1 }
 0x3c2   :  { %1921 = vtanh.f32 %v521_v10 }
 0x3c3   :  { %v1725_v12 = vpop.f32.mrf.mxu1  ;;  %v561_v13 = vpop.f32.mrf.mxu0 }
 0x3c5   :  { %v1732_v14 = vpop.f32.mrf.mxu0  ;;  %v601_v15 = vpop.f32.mrf.mxu1 }
 0x3c6   :  { %v602_v16 = vadd.f32 %v601_v15, %v561_v13 }
 0x3c7   :  { %v564_v17 = vpop.f32.mrf.mxu0  ;;  %v1740_v18 = vpop.f32.mrf.mxu1 }
 0x3c8   :  { %v607_v19 = vadd.f32 %v2207_v58, %v602_v16 }
 0x3c9   :  { %v1733_v20 = vpop.f32.mrf.mxu0  ;;  %v604_v21 = vpop.f32.mrf.mxu1 }
 0x3ca   :  { %1923 = vtanh.f32 %v607_v19 }
 0x3cb   :  { %v1741_v23 = vpop.f32.mrf.mxu1 }
 0x3cf   :  { %v1922_v24 = vpop.eup %1921 }
 0x3d0   :  { %v523_v26 = vpack.c.bf16 %v1922_v24, %v1922_v24 }
 0x3d2   :  { %v611_v27 = vrot.slane %v523_v26, 2 }
 0x3d4   :  { %1747 = vmatmul.mubr.msk.bf16.vlgmr.msra.gmra.mxu0 %vm200_vm4, %v611_v27 }
 0x3d5   :  { %1759 = vmatpush3.bf16.msra.mxu0 %v2150_v28  ;;  %1762 = vmatprep.mubr.msk.bf16.mxu0 %vm1993_vm0, %v1992_v2 }
 0x3d6   :  { %1760 = vmatprep.subr.bf16.mxu0 %v1992_v2 }
 0x3d7   :  { %v1924_v30 = vpop.eup %1923 }
 0x3d8   :  { %v609_v31 = vpack.c.bf16 %v1924_v30, %v1924_v30 }
 0x3d9   :  { %1761 = vmatpush3.bf16.msra.mxu0 %v2157_v29 }
 0x3da   :  { %1755 = vmatmul.mubr.msk.bf16.vlgmr.msra.gmra.mxu1 %vm200_vm4, %v609_v31  ;;  %1774 = vmatprep.subr.bf16.mxu0 %v1992_v2  ;;  %v1382_v55 = vrot.slane %v609_v31, 7 }
 0x3db   :  { %1767 = vmatpush3.bf16.msra.mxu1 %v2123_v22  ;;  %1770 = vmatprep.mubr.msk.bf16.mxu1 %vm1993_vm0, %v1992_v2 }
 0x3dc   :  { %1763 = vmatmul.mubr.msk.bf16.vlgmr.msra.gmra.mxu0 %vm200_vm4, %v611_v27  ;;  %1768 = vmatprep.subr.bf16.mxu1 %v1992_v2  ;;  %v1397_v59 = vsel %vm1395_vm5, %v2215_v6, %v1382_v55 }
 0x3dd   :  { %1775 = vmatpush3.bf16.msra.mxu0 %v2172_v43  ;;  %1778 = vmatprep.mubr.msk.bf16.mxu0 %vm1993_vm0, %v1992_v2 }
 0x3de   :  { %1776 = vmatprep.subr.bf16.mxu0 %v1992_v2 }
 0x3df   :  { %1769 = vmatpush3.bf16.msra.mxu1 %v2130_v25 }
 0x3e0   :  { %1782 = vmatprep.subr.bf16.mxu1 %v1992_v2 }
 0x3e1   :  { %1777 = vmatpush3.bf16.msra.mxu0 %v2180_v45 }
 0x3e2   :  { %1790 = vmatprep.subr.bf16.mxu0 %v1992_v2 }
 0x494   :  { %v649_v32 = vpop.f32.mrf.mxu0 }
 0x495   :  { %v656_v33 = vrot.slane %v649_v32, 2 }
 0x496   :  { %v1748_v35 = vpop.f32.mrf.mxu0 }
 0x497   :  { %v658_v37 = vadd.f32 %v656_v33, %v2166_v36 }
 0x498   :  { %v652_v38 = vpop.f32.mrf.mxu0 }
 0x499   :  { %1925 = vtanh.f32 %v658_v37 }
 0x49a   :  { %v1749_v39 = vpop.f32.mrf.mxu0  ;;  %v698_v40 = vpop.f32.mrf.mxu1 }
 0x49c   :  { %v1756_v41 = vpop.f32.mrf.mxu1  ;;  %v738_v42 = vpop.f32.mrf.mxu0 }
 0x49d   :  { %v739_v44 = vadd.f32 %v738_v42, %v698_v40 }
 0x49e   :  { %v701_v46 = vpop.f32.mrf.mxu1  ;;  %v1764_v47 = vpop.f32.mrf.mxu0 }
 0x49f   :  { %v744_v48 = vadd.f32 %v2207_v58, %v739_v44 }
 0x4a0   :  { %v1757_v49 = vpop.f32.mrf.mxu1  ;;  %v741_v50 = vpop.f32.mrf.mxu0 }
 0x4a1   :  { %1927 = vtanh.f32 %v744_v48 }
 0x4a2   :  { %v1765_v51 = vpop.f32.mrf.mxu0 }
 0x4a6   :  { %v1926_v52 = vpop.eup %1925 }
 0x4a7   :  { %v660_v53 = vpack.c.bf16 %v1926_v52, %v1926_v52 }
 0x4a9   :  { %v748_v54 = vrot.slane %v660_v53, 3 }
 0x4ab   :  { %1771 = vmatmul.mubr.msk.bf16.vlgmr.msra.gmra.mxu1 %vm200_vm4, %v748_v54 }
 0x4ac   :  { %1783 = vmatpush3.bf16.msra.mxu1 %v2150_v28  ;;  %1786 = vmatprep.mubr.msk.bf16.mxu1 %vm1993_vm0, %v1992_v2 }
 0x4ad   :  { %1784 = vmatprep.subr.bf16.mxu1 %v1992_v2 }
 0x4ae   :  { %v1928_v36 = vpop.eup %1927 }
 0x4af   :  { %v746_v56 = vpack.c.bf16 %v1928_v36, %v1928_v36 }
 0x4b0   :  { %1785 = vmatpush3.bf16.msra.mxu1 %v2157_v29 }
 0x4b1   :  { %v1384_v57 = vrot.slane %v746_v56, 6  ;;  %1779 = vmatmul.mubr.msk.bf16.vlgmr.msra.gmra.mxu0 %vm200_vm4, %v746_v56  ;;  %1798 = vmatprep.subr.bf16.mxu1 %v1992_v2 }
 0x4b2   :  { %1791 = vmatpush3.bf16.msra.mxu0 %v2123_v22  ;;  %1794 = vmatprep.mubr.msk.bf16.mxu0 %vm1993_vm0, %v1992_v2 }
 0x4b3   :  { %v1400_v60 = vsel %vm1398_vm6, %v1397_v59, %v1384_v57  ;;  %1787 = vmatmul.mubr.msk.bf16.vlgmr.msra.gmra.mxu1 %vm200_vm4, %v748_v54  ;;  %1792 = vmatprep.subr.bf16.mxu0 %v1992_v2 }
 0x4b4   :  { %1799 = vmatpush3.bf16.msra.mxu1 %v2172_v43  ;;  %1802 = vmatprep.mubr.msk.bf16.mxu1 %vm1993_vm0, %v1992_v2 }
 0x4b5   :  { %1800 = vmatprep.subr.bf16.mxu1 %v1992_v2 }
 0x4b6   :  { %1793 = vmatpush3.bf16.msra.mxu0 %v2130_v25 }
 0x4b7   :  { %1806 = vmatprep.subr.bf16.mxu0 %v1992_v2 }
 0x4b8   :  { %1801 = vmatpush3.bf16.msra.mxu1 %v2180_v45 }
 0x4b9   :  { %1814 = vmatprep.subr.bf16.mxu1 %v1992_v2 }
 0x56b   :  { %v786_v61 = vpop.f32.mrf.mxu1 }
 0x56c   :  { %v792_v62 = vadd.f32 %v786_v61, %v2164_v34 }
 0x56d   :  { %v1772_v63 = vpop.f32.mrf.mxu1 }
 0x56e   :  { %1929 = vtanh.f32 %v792_v62 }
 0x56f   :  { %v789_v0 = vpop.f32.mrf.mxu1 }
 0x571   :  { %v1773_v1 = vpop.f32.mrf.mxu1  ;;  %v832_v3 = vpop.f32.mrf.mxu0 }
 0x573   :  { %v1780_v4 = vpop.f32.mrf.mxu0  ;;  %v872_v5 = vpop.f32.mrf.mxu1 }
 0x574   :  { %v873_v6 = vadd.f32 %v872_v5, %v832_v3 }
 0x575   :  { %v835_v7 = vpop.f32.mrf.mxu0  ;;  %v1788_v8 = vpop.f32.mrf.mxu1 }
 0x576   :  { %v878_v9 = vadd.f32 %v2207_v58, %v873_v6 }
 0x577   :  { %v1781_v10 = vpop.f32.mrf.mxu0  ;;  %v875_v11 = vpop.f32.mrf.mxu1 }
 0x578   :  { %1931 = vtanh.f32 %v878_v9 }
 0x579   :  { %v1789_v12 = vpop.f32.mrf.mxu1 }
 0x57b   :  { %v1930_v13 = vpop.eup %1929 }
 0x57c   :  { %v794_v14 = vpack.c.bf16 %v1930_v13, %v1930_v13 }
 0x57e   :  { %1795 = vmatmul.mubr.msk.bf16.vlgmr.msra.gmra.mxu0 %vm200_vm4, %v794_v14 }
 0x57f   :  { %1807 = vmatpush3.bf16.msra.mxu0 %v2150_v28  ;;  %1810 = vmatprep.mubr.msk.bf16.mxu0 %vm1993_vm0, %v1992_v2 }
 0x580   :  { %1808 = vmatprep.subr.bf16.mxu0 %v1992_v2 }
 0x583   :  { %1809 = vmatpush3.bf16.msra.mxu0 %v2157_v29 }
 0x584   :  { %1822 = vmatprep.subr.bf16.mxu0 %v1992_v2 }
 0x585   :  { %v1932_v15 = vpop.eup %1931 }
 0x586   :  { %v880_v16 = vpack.c.bf16 %v1932_v15, %v1932_v15  ;;  %1811 = vmatmul.mubr.msk.bf16.vlgmr.msra.gmra.mxu0 %vm200_vm4, %v794_v14 }
 0x587   :  { %1823 = vmatpush3.bf16.msra.mxu0 %v2172_v43  ;;  %1826 = vmatprep.mubr.msk.bf16.mxu0 %vm1993_vm0, %v1992_v2 }
 0x588   :  { %v1386_v17 = vrot.slane %v880_v16, 5  ;;  %1803 = vmatmul.mubr.msk.bf16.vlgmr.msra.gmra.mxu1 %vm200_vm4, %v880_v16  ;;  %1824 = vmatprep.subr.bf16.mxu0 %v1992_v2 }
 0x589   :  { %1815 = vmatpush3.bf16.msra.mxu1 %v2123_v22  ;;  %1818 = vmatprep.mubr.msk.bf16.mxu1 %vm1993_vm0, %v1992_v2 }
 0x58a   :  { %v1403_v18 = vsel %vm1401_vm7, %v1400_v60, %v1386_v17  ;;  %1816 = vmatprep.subr.bf16.mxu1 %v1992_v2 }
 0x58b   :  { %1825 = vmatpush3.bf16.msra.mxu0 %v2180_v45 }
 0x58c   :  { %1838 = vmatprep.subr.bf16.mxu0 %v1992_v2 }
 0x58d   :  { %1817 = vmatpush3.bf16.msra.mxu1 %v2130_v25 }
 0x58e   :  { %1830 = vmatprep.subr.bf16.mxu1 %v1992_v2 }
 0x63e   :  { %v918_v19 = vpop.f32.mrf.mxu0 }
 0x63f   :  { %v925_v20 = vrot.slane %v918_v19, 6 }
 0x640   :  { %v1796_v21 = vpop.f32.mrf.mxu0 }
 0x641   :  { %v927_v23 = vadd.f32 %v925_v20, %v2164_v34 }
 0x642   :  { %v921_v24 = vpop.f32.mrf.mxu0 }
 0x643   :  { %1933 = vtanh.f32 %v927_v23 }
 0x644   :  { %v1797_v26 = vpop.f32.mrf.mxu0 }
 0x646   :  { %v1007_v27 = vpop.f32.mrf.mxu0 }
 0x648   :  { %v967_v30 = vpop.f32.mrf.mxu1  ;;  %v1812_v31 = vpop.f32.mrf.mxu0 }
 0x649   :  { %v1008_v32 = vadd.f32 %v1007_v27, %v967_v30  ;;  %v1913_v30 = vld [vmem:[%s2382_s9 + $0x8] sm:$0xff]   ;;  %v1914_v31 = vld [vmem:[%s2382_s9] sm:$0xff]   ;;  %s1995_s9 = smov [#allocation4]  }
 0x64a   :  { %v1804_v33 = vpop.f32.mrf.mxu1  ;;  %v1010_v35 = vpop.f32.mrf.mxu0  ;;  %s1506_s23 = sshll.u32 %s1995_s9, 4  ;;  %s1507_s23 = int_to_ptr.vmem [resolvable:$true] %s1506_s23 }
 0x64b   :  { %v1013_v37 = vadd.f32 %v2207_v58, %v1008_v32  ;;  %s1947_s24 = scalar_lea.vmem %s1507_s23, 64  ;;  %p1952_p1 = scmp.lt.s32.totalorder %s1507_s23, %s1507_s23 }
 0x64c   :  { %v970_v38 = vpop.f32.mrf.mxu1  ;;  %v1813_v39 = vpop.f32.mrf.mxu0  ;;  %p1948_p0 = scmp.ne.s32.totalorder %s1507_s23, %s1947_s24  ;;  %p1953_p2 = scmp.lt.s32.totalorder %s1947_s24, %s1947_s24 }
 0x64d   :  { %1935 = vtanh.f32 %v1013_v37 }
 0x64e   :  { %v1805_v40 = vpop.f32.mrf.mxu1  ;;  %p1954_p3 = por %p1953_p2, %p1952_p1 }
 0x650   :  { %v1934_v41 = vpop.eup %1933  ;;  %p1955_p4 = pnand %p1954_p3, %p1948_p0 }
 0x651   :  { %v929_v42 = vpack.c.bf16 %v1934_v41, %v1934_v41 }
 0x653   :  { %v1017_v44 = vrot.slane %v929_v42, 1 }
 0x655   :  { %1819 = vmatmul.mubr.msk.bf16.vlgmr.msra.gmra.mxu1 %vm200_vm4, %v1017_v44 }
 0x656   :  { %1831 = vmatpush3.bf16.msra.mxu1 %v2150_v28  ;;  %1834 = vmatprep.mubr.msk.bf16.mxu1 %vm1993_vm0, %v1992_v2 }
 0x657   :  { %1832 = vmatprep.subr.bf16.mxu1 %v1992_v2 }
 0x65a   :  { %v1936_v46 = vpop.eup %1935  ;;  %1833 = vmatpush3.bf16.msra.mxu1 %v2157_v29 }
 0x65b   :  { %v1015_v47 = vpack.c.bf16 %v1936_v46, %v1936_v46  ;;  %1846 = vmatprep.subr.bf16.mxu1 %v1992_v2 }
 0x65d   :  { %v1388_v48 = vrot.slane %v1015_v47, 4  ;;  %1827 = vmatmul.mubr.msk.bf16.vlgmr.msra.gmra.mxu0 %vm200_vm4, %v1015_v47  ;;  %1835 = vmatmul.mubr.msk.bf16.vlgmr.msra.gmra.mxu1 %vm200_vm4, %v1017_v44 }
 0x65e   :  { %1839 = vmatpush3.bf16.msra.mxu0 %v2123_v22  ;;  %1842 = vmatprep.mubr.msk.bf16.mxu0 %vm1993_vm0, %v1992_v2 }
 0x65f   :  { %1840 = vmatprep.subr.bf16.mxu0 %v1992_v2  ;;  %1847 = vmatpush3.bf16.msra.mxu1 %v2172_v43  ;;  %v1406_v49 = vsel %vm1404_vm8, %v1403_v18, %v1388_v48 }
 0x660   :  { %1848 = vmatprep.subr.bf16.mxu1 %v1992_v2  ;;  %1850 = vmatprep.mubr.msk.bf16.mxu1 %vm1993_vm0, %v1992_v2 }
 0x662   :  { %1841 = vmatpush3.bf16.msra.mxu0 %v2130_v25 }
 0x663   :  { %1854 = vmatprep.subr.bf16.mxu0 %v1992_v2  ;;  %1849 = vmatpush3.bf16.msra.mxu1 %v2180_v45 }
 0x664   :  { %1862 = vmatprep.subr.bf16.mxu1 %v1992_v2 }
 0x715   :  { %v1055_v22 = vpop.f32.mrf.mxu1 }
 0x716   :  { %v1062_v50 = vrot.slane %v1055_v22, 4 }
 0x717   :  { %v1820_v51 = vpop.f32.mrf.mxu1 }
 0x718   :  { %v1064_v52 = vadd.f32 %v1062_v50, %v2164_v34 }
 0x719   :  { %v1058_v53 = vpop.f32.mrf.mxu1 }
 0x71a   :  { %1937 = vtanh.f32 %v1064_v52 }
 0x71b   :  { %v1821_v54 = vpop.f32.mrf.mxu1 }
 0x71d   :  { %v1104_v36 = vpop.f32.mrf.mxu0  ;;  %v1144_v55 = vpop.f32.mrf.mxu1 }
 0x71e   :  { %v1145_v56 = vadd.f32 %v1144_v55, %v1104_v36 }
 0x71f   :  { %v1828_v57 = vpop.f32.mrf.mxu0  ;;  %v1836_v59 = vpop.f32.mrf.mxu1 }
 0x720   :  { %v1150_v25 = vadd.f32 %v2207_v58, %v1145_v56 }
 0x721   :  { %v1107_v60 = vpop.f32.mrf.mxu0  ;;  %v1147_v61 = vpop.f32.mrf.mxu1 }
 0x722   :  { %1939 = vtanh.f32 %v1150_v25 }
 0x723   :  { %v1829_v62 = vpop.f32.mrf.mxu0  ;;  %v1837_v63 = vpop.f32.mrf.mxu1 }
 0x727   :  { %v1938_v0 = vpop.eup %1937 }
 0x728   :  { %v1066_v1 = vpack.c.bf16 %v1938_v0, %v1938_v0 }
 0x72a   :  { %v1154_v3 = vrot.slane %v1066_v1, 2 }
 0x72c   :  { %1843 = vmatmul.mubr.msk.bf16.vlgmr.msra.gmra.mxu0 %vm200_vm4, %v1154_v3 }
 0x72d   :  { %1855 = vmatpush3.bf16.msra.mxu0 %v2150_v28  ;;  %1858 = vmatprep.mubr.msk.bf16.mxu0 %vm1993_vm0, %v1992_v2 }
 0x72e   :  { %1856 = vmatprep.subr.bf16.mxu0 %v1992_v2 }
 0x72f   :  { %v1940_v4 = vpop.eup %1939 }
 0x730   :  { %v1152_v5 = vpack.c.bf16 %v1940_v4, %v1940_v4 }
 0x731   :  { %1857 = vmatpush3.bf16.msra.mxu0 %v2157_v29 }
 0x732   :  { %v1390_v6 = vrot.slane %v1152_v5, 3  ;;  %1851 = vmatmul.mubr.msk.bf16.vlgmr.msra.gmra.mxu1 %vm200_vm4, %v1152_v5  ;;  %1870 = vmatprep.subr.bf16.mxu0 %v1992_v2 }
 0x733   :  { %1863 = vmatpush3.bf16.msra.mxu1 %v2172_v43  ;;  %1866 = vmatprep.mubr.msk.bf16.mxu1 %vm1993_vm0, %v1992_v2 }
 0x734   :  { %1859 = vmatmul.mubr.msk.bf16.vlgmr.msra.gmra.mxu0 %vm200_vm4, %v1154_v3  ;;  %1864 = vmatprep.subr.bf16.mxu1 %v1992_v2  ;;  %v1409_v7 = vsel %vm1407_vm9, %v1406_v49, %v1390_v6 }
 0x735   :  { %1871 = vmatpush3.bf16.msra.mxu0 %v2150_v28  ;;  %1874 = vmatprep.mubr.msk.bf16.mxu0 %vm1993_vm0, %v1992_v2 }
 0x736   :  { %1872 = vmatprep.subr.bf16.mxu0 %v1992_v2 }
 0x737   :  { %1865 = vmatpush3.bf16.msra.mxu1 %v2180_v45 }
 0x738   :  { %1878 = vmatprep.subr.bf16.mxu1 %v1992_v2 }
 0x739   :  { %1873 = vmatpush3.bf16.msra.mxu0 %v2157_v29 }
 0x7ec   :  { %v1192_v43 = vpop.f32.mrf.mxu0 }
 0x7ed   :  { %v1199_v8 = vrot.slane %v1192_v43, 2 }
 0x7ee   :  { %v1844_v9 = vpop.f32.mrf.mxu0 }
 0x7ef   :  { %v1201_v10 = vadd.f32 %v1199_v8, %v2164_v34 }
 0x7f0   :  { %v1195_v11 = vpop.f32.mrf.mxu0 }
 0x7f1   :  { %1941 = vtanh.f32 %v1201_v10 }
 0x7f2   :  { %v1845_v12 = vpop.f32.mrf.mxu0  ;;  %v1241_v28 = vpop.f32.mrf.mxu1 }
 0x7f4   :  { %v1852_v13 = vpop.f32.mrf.mxu1  ;;  %v1281_v14 = vpop.f32.mrf.mxu0 }
 0x7f5   :  { %v1282_v15 = vadd.f32 %v1281_v14, %v1241_v28 }
 0x7f6   :  { %v1244_v16 = vpop.f32.mrf.mxu1  ;;  %v1860_v17 = vpop.f32.mrf.mxu0 }
 0x7f7   :  { %v1287_v45 = vadd.f32 %v2207_v58, %v1282_v15 }
 0x7f8   :  { %v1853_v18 = vpop.f32.mrf.mxu1  ;;  %v1284_v19 = vpop.f32.mrf.mxu0 }
 0x7f9   :  { %1943 = vtanh.f32 %v1287_v45 }
 0x7fa   :  { %v1861_v29 = vpop.f32.mrf.mxu0 }
 0x7fe   :  { %v1942_v20 = vpop.eup %1941 }
 0x7ff   :  { %v1203_v21 = vpack.c.bf16 %v1942_v20, %v1942_v20  ;;  %1485 = vst.msk [vmem:[#allocation4 - $0x6] sm:$0xc0] %vm1484_vm10, %v1942_v20 }
 0x801   :  { %v1334_v34 = vrot.slane %v1203_v21, 3 }
 0x803   :  { %1875 = vmatmul.mubr.msk.bf16.vlgmr.msra.gmra.mxu0 %vm200_vm4, %v1334_v34 }
 0x806   :  { %v1944_v23 = vpop.eup %1943 }
 0x807   :  { %v1289_v24 = vpack.c.bf16 %v1944_v23, %v1944_v23 }
 0x809   :  { %v1392_v26 = vrot.slane %v1289_v24, 2  ;;  %1867 = vmatmul.mubr.msk.bf16.vlgmr.msra.gmra.mxu1 %vm200_vm4, %v1289_v24 }
 0x80a   :  { %1882 = vmatprep.mubr.msk.bf16.mxu1 %vm1993_vm0, %v1992_v2  ;;  %1879 = vmatpush3.bf16.msra.mxu1 %v1913_v30 }
 0x80b   :  { %v1412_v27 = vsel %vm1410_vm11, %v1409_v7, %v1392_v26  ;;  %1880 = vmatprep.subr.bf16.mxu1 %v1992_v2 }
 0x80e   :  { %1881 = vmatpush3.bf16.msra.mxu1 %v1914_v31 }
 0x8c3   :  { %v1372_v32 = vpop.f32.mrf.mxu0 }
 0x8c5   :  { %v1876_v33 = vpop.f32.mrf.mxu0 }
 0x8c7   :  { %v1375_v35 = vpop.f32.mrf.mxu0 }
 0x8c9   :  { %v1327_v37 = vpop.f32.mrf.mxu1  ;;  %v1877_v38 = vpop.f32.mrf.mxu0 }
 0x8ca   :  { %v1373_v39 = vadd.f32 %v1372_v32, %v1327_v37 }
 0x8cb   :  { %v1868_v40 = vpop.f32.mrf.mxu1 }
 0x8cc   :  { %v1378_v41 = vadd.f32 %v2207_v58, %v1373_v39 }
 0x8cd   :  { %v1330_v42 = vpop.f32.mrf.mxu1 }
 0x8ce   :  { %1945 = vtanh.f32 %v1378_v41 }
 0x8cf   :  { %v1869_v44 = vpop.f32.mrf.mxu1 }
 0x8db   :  { %v1946_v46 = vpop.eup %1945 }
 0x8dc   :  { %v1380_v47 = vpack.c.bf16 %v1946_v46, %v1946_v46  ;;  %1488 = vst.msk [vmem:[#allocation4 + $0x2] sm:$0x3] %vm1487_vm12, %v1946_v46 }
 0x8de   :  { %v1394_v48 = vrot.slane %v1380_v47, 1 }
 0x8e0   :  { %v1415_v2 = vsel %vm1413_vm13, %v1412_v27, %v1394_v48 }
 0x8e1   :  { %1883 = vmatmul.mubr.msk.bf16.vlgmr.msra.gmra.mxu1 %vm200_vm4, %v1415_v2 }
 0x8e2   :  { %1958 = shalt.err (!%p1955_p4)
}
 0x8e3   :  { %s1996_s25 = smov 32   ;;  %s1997_s2 = smov 2   ;;  %v1567_v58 = vld [vmem:[%s2383_s10] ss:$0 sm:$0xff] }
 0x8e4   :  { %1512 = dma.vmem_to_hbm [thread:$0]  %s1507_s23, 64, %s2385_s12, [#allocation5], %s1996_s25, %s1996_s25, %s1997_s2  }
 0x8e5   :  { %s1998_s29 = smov [#allocation2]  }
 0x8e6   :  { %s1494_s4 = sshll.u32 %s1998_s29, 4  ;;  %s1495_s4 = int_to_ptr.vmem [resolvable:$true] %s1494_s4 }
 0x8e7   :  { %s1967_s0 = scalar_lea.vmem %s1495_s4, 256  ;;  %p1972_p6 = scmp.lt.s32.totalorder %s1495_s4, %s1495_s4 }
 0x8e8   :  { %p1968_p5 = scmp.ne.s32.totalorder %s1495_s4, %s1967_s0  ;;  %p1973_p7 = scmp.lt.s32.totalorder %s1967_s0, %s1967_s0 }
 0x8ea   :  { %p1974_p8 = por %p1973_p7, %p1972_p6 }
 0x8ec   :  { %p1975_p9 = pnand %p1974_p8, %p1968_p5 }
 0x9a1   :  { %v1475_v49 = vpop.f32.mrf.mxu1 }
 0x9a2   :  { %v1476_v22 = vadd.f32 %v1567_v58, %v1475_v49 }
 0x9a3   :  { %v1884_v50 = vpop.f32.mrf.mxu1 }
 0x9a4   :  { %1482 = vst [vmem:[#allocation2] sm:$0xff] %v1476_v22 }
 0x9a5   :  { %v1478_v51 = vpop.f32.mrf.mxu1 }
 0x9a6   :  { %v1479_v52 = vadd.f32 %v1567_v58, %v1478_v51 }
 0x9a7   :  { %v1885_v53 = vpop.f32.mrf.mxu1 }
 0x9a8   :  { %1483 = vst [vmem:[#allocation2 + $0x8] sm:$0xff] %v1479_v52 }
 0x9a9   :  { %1978 = shalt.err (!%p1975_p9)
}
 0x9aa   :  { %s1999_s12 = smov 128   ;;  %s2000_s10 = smov 8  }
 0x9ab   :  { %1500 = dma.vmem_to_hbm [thread:$0]  %s1495_s4, 256, %s2384_s11, [#allocation3], %s1999_s12, %s1999_s12, %s2000_s10  }
 0x9ac   :  { %1987 = dma.done.wait [#allocation3], 256  }
 0x9ad   :  { %1988 = vsyncadd [#allocation3], 4294967040 }
 0x9ae   :  { %1989 = dma.done.wait [#allocation5], 64  }
 0x9af   :  { %1990 = vsyncadd [#allocation5], 4294967232 }
 0x9b0   :  { %1519 = vsyncpa [#allocation3], 1 }
 0x9b1   :  { %1520 = vsyncpa [#allocation5], 1 }

</bundles_post_ra>
